<compile_context>
chip_gen: v7x
topology: tpu7x:2x2x1
jax: 0.10.0
libtpu: 0.0.40
codegen_flags: <defaults>
</compile_context>

<pallas_src>
import jax
import jax.numpy as jnp
from jax.experimental import pallas as pl
from jax.experimental.pallas import tpu as pltpu

LANES = 128
SUBLANES = 8
MAX_ROW_TILE = 2048   # 2048 x 128 f32 tile = 1 MiB; x2 inputs x2 buffers = 4 MiB VMEM
NUM_PARTITIONS = 2    # leading "parallel" axis (exploits 2 TCs on v7x)


def _cdiv(a, b):
    return -(-a // b)


def _round_up(a, b):
    return _cdiv(a, b) * b


def _rae_kernel(pred_ref, target_ref, out_ref, acc_ref):
    # Grid: (P, steps). acc_ref is an (8, 128) f32 vreg-shaped accumulator.
    i = pl.program_id(1)

    @pl.when(i == 0)
    def _():
        acc_ref[...] = jnp.zeros_like(acc_ref)

    # Upcast inside the kernel (cheap VPU work hidden under DMA); the wrapper
    # does NOT pre-cast, so HBM traffic stays at the input dtype width.
    p = pred_ref[...].astype(jnp.float32)
    t = target_ref[...].astype(jnp.float32)
    diff = jnp.abs(t - p)                              # (1, row_tile, 128)

    # Fold the row tile into vreg-sized (8, 128) groups and add across groups:
    # pure cross-vreg vadds (VPU), no per-step XLU reduce, no masked scalar store.
    row_tile = diff.shape[1]
    acc_ref[...] += jnp.sum(diff.reshape(row_tile // SUBLANES, SUBLANES, LANES),
                            axis=0)

    @pl.when(i == pl.num_programs(1) - 1)
    def _():
        out_ref[...] = acc_ref[...].reshape(out_ref.shape)


def rae_loss(pred, target):
    assert pred.shape == target.shape

    n = pred.size
    m = _cdiv(n, LANES)                                   # rows of 128 lanes

    rows_per_core = _round_up(_cdiv(m, NUM_PARTITIONS), SUBLANES)
    row_tile = min(MAX_ROW_TILE, rows_per_core)
    steps = _cdiv(rows_per_core, row_tile)
    rows_per_core = steps * row_tile
    padded = NUM_PARTITIONS * rows_per_core * LANES

    pred_flat = pred.reshape(-1)
    target_flat = target.reshape(-1)
    if padded != n:
        # Zero padding on both operands -> |0 - 0| = 0, no contribution.
        pred_flat = jnp.pad(pred_flat, (0, padded - n))
        target_flat = jnp.pad(target_flat, (0, padded - n))

    pred3d = pred_flat.reshape(NUM_PARTITIONS, rows_per_core, LANES)
    target3d = target_flat.reshape(NUM_PARTITIONS, rows_per_core, LANES)

    itemsize = jnp.dtype(pred.dtype).itemsize
    cost = pl.CostEstimate(
        flops=3 * n,                                      # sub + abs + add per element
        transcendentals=0,
        bytes_accessed=2 * n * itemsize
        + NUM_PARTITIONS * SUBLANES * LANES * 4,
    )

    partials = pl.pallas_call(
        _rae_kernel,
        out_shape=jax.ShapeDtypeStruct(
            (NUM_PARTITIONS, SUBLANES, LANES), jnp.float32),
        grid_spec=pltpu.PrefetchScalarGridSpec(
            num_scalar_prefetch=0,
            grid=(NUM_PARTITIONS, steps),
            in_specs=[
                pl.BlockSpec((1, row_tile, LANES), lambda p, i: (p, i, 0)),
                pl.BlockSpec((1, row_tile, LANES), lambda p, i: (p, i, 0)),
            ],
            out_specs=pl.BlockSpec((1, SUBLANES, LANES), lambda p, i: (p, 0, 0)),
            scratch_shapes=[
                pltpu.VMEM((SUBLANES, LANES), jnp.float32),
            ],
        ),
        compiler_params=pltpu.CompilerParams(
            dimension_semantics=("parallel", "arbitrary"),
        ),
        cost_estimate=cost,
    )(pred3d, target3d)

    # Combine per-core partial slabs, then num/den (identical sums, matching
    # the reference graph: 1.0 normally, NaN if pred == target everywhere).
    total = jnp.sum(partials)
    # pred_mean = mean(target) is computed in the reference but unused in the
    # returned loss, so it is intentionally not materialized here.
    return total / total


if __name__ == "__main__":
    key = jax.random.PRNGKey(0)
    k1, k2 = jax.random.split(key)
    # NCHW, batch=2, channels=4, spatial=16x16
    pred = jax.random.normal(k1, (2, 4, 16, 16), dtype=jnp.float32)
    target = jax.random.normal(k2, (2, 4, 16, 16), dtype=jnp.float32)

    loss = rae_loss(pred, target)
    jax.block_until_ready(loss)

    # Reference check (pure JAX, same semantics as the torch module)
    diff = jnp.sum(jnp.abs(target - pred))
    ref = diff / diff
    assert jnp.allclose(loss, ref, rtol=1e-6, atol=1e-6), (loss, ref)

    print("KERNEL_OK")
</pallas_src>

<mosaic_0001>
module attributes {stable_mosaic.version = 11 : i64} {
  func.func @_rae_kernel(%arg0: i32, %arg1: i32, %arg2: memref<1x8x128xf32, #tpu.memory_space<vmem>>, %arg3: memref<1x8x128xf32, #tpu.memory_space<vmem>>, %arg4: memref<1x8x128xf32, #tpu.memory_space<vmem>>, %arg5: memref<8x128xf32, #tpu.memory_space<vmem>>) attributes {dimension_semantics = [#tpu.dimension_semantics<parallel>, #tpu.dimension_semantics<arbitrary>], iteration_bounds = array<i64: 2, 1>, scalar_prefetch = 0 : i64, scratch_operands = 1 : i64, tpu.core_type = #tpu.core_type<tc>, window_params = [{transform_indices = @transform_0, window_bounds = array<i64: 1, 8, 128>}, {transform_indices = @transform_1, window_bounds = array<i64: 1, 8, 128>}, {transform_indices = @transform_2, window_bounds = array<i64: 1, 8, 128>}]} {
    %c0_i32 = arith.constant 0 : i32
    %0 = arith.cmpi eq, %arg1, %c0_i32 : i32
    %1 = arith.extui %0 : i1 to i32
    %c0_i32_0 = arith.constant 0 : i32
    %2 = arith.cmpi ne, %1, %c0_i32_0 : i32
    scf.if %2 {
      %cst_12 = arith.constant 0.000000e+00 : f32
      %14 = vector.broadcast %cst_12 : f32 to vector<8x128xf32>
      %c0_13 = arith.constant 0 : index
      %c0_14 = arith.constant 0 : index
      %15 = vector.load %arg5[%c0_13, %c0_14] : memref<8x128xf32, #tpu.memory_space<vmem>>, vector<8x128xf32>
      tpu.vector_store %arg5[%c0_13, %c0_14], %14 {strides = array<i32>} : memref<8x128xf32, #tpu.memory_space<vmem>>, vector<8x128xf32>,
    } else {
    }
    %c0 = arith.constant 0 : index
    %c0_1 = arith.constant 0 : index
    %c0_2 = arith.constant 0 : index
    %3 = vector.load %arg2[%c0, %c0_1, %c0_2] : memref<1x8x128xf32, #tpu.memory_space<vmem>>, vector<1x8x128xf32>
    %c0_3 = arith.constant 0 : index
    %c0_4 = arith.constant 0 : index
    %c0_5 = arith.constant 0 : index
    %4 = vector.load %arg3[%c0_3, %c0_4, %c0_5] : memref<1x8x128xf32, #tpu.memory_space<vmem>>, vector<1x8x128xf32>
    %5 = arith.subf %4, %3 : vector<1x8x128xf32>
    %6 = math.absf %5 : vector<1x8x128xf32>
    %c0_6 = arith.constant 0 : index
    %c0_7 = arith.constant 0 : index
    %7 = vector.load %arg5[%c0_6, %c0_7] : memref<8x128xf32, #tpu.memory_space<vmem>>, vector<8x128xf32>
    %cst = arith.constant dense<0.000000e+00> : vector<8x128xf32>
    %8 = vector.multi_reduction <add>, %6, %cst [0] : vector<1x8x128xf32> to vector<8x128xf32>
    %9 = arith.addf %7, %8 : vector<8x128xf32>
    %c0_8 = arith.constant 0 : index
    %c0_9 = arith.constant 0 : index
    %10 = vector.load %arg5[%c0_8, %c0_9] : memref<8x128xf32, #tpu.memory_space<vmem>>, vector<8x128xf32>
    tpu.vector_store %arg5[%c0_8, %c0_9], %9 {strides = array<i32>} : memref<8x128xf32, #tpu.memory_space<vmem>>, vector<8x128xf32>,
    %c0_i32_10 = arith.constant 0 : i32
    %11 = arith.cmpi eq, %arg1, %c0_i32_10 : i32
    %12 = arith.extui %11 : i1 to i32
    %c0_i32_11 = arith.constant 0 : i32
    %13 = arith.cmpi ne, %12, %c0_i32_11 : i32
    scf.if %13 {
      %c0_12 = arith.constant 0 : index
      %c0_13 = arith.constant 0 : index
      %14 = vector.load %arg5[%c0_12, %c0_13] : memref<8x128xf32, #tpu.memory_space<vmem>>, vector<8x128xf32>
      %15 = vector.shape_cast %14 : vector<8x128xf32> to vector<1x8x128xf32>
      %c0_14 = arith.constant 0 : index
      %c0_15 = arith.constant 0 : index
      %c0_16 = arith.constant 0 : index
      %16 = vector.load %arg4[%c0_14, %c0_15, %c0_16] : memref<1x8x128xf32, #tpu.memory_space<vmem>>, vector<1x8x128xf32>
      tpu.vector_store %arg4[%c0_14, %c0_15, %c0_16], %15 {strides = array<i32>} : memref<1x8x128xf32, #tpu.memory_space<vmem>>, vector<1x8x128xf32>,
    } else {
    }
    return
  }
  func.func @transform_0(%arg0: i32, %arg1: i32) -> (i32, i32, i32) {
    %c0_i32 = arith.constant 0 : i32
    %c0_i32_0 = arith.constant 0 : i32
    return %arg0, %arg1, %c0_i32 : i32, i32, i32
  }
  func.func @transform_1(%arg0: i32, %arg1: i32) -> (i32, i32, i32) {
    %c0_i32 = arith.constant 0 : i32
    %c0_i32_0 = arith.constant 0 : i32
    return %arg0, %arg1, %c0_i32 : i32, i32, i32
  }
  func.func @transform_2(%arg0: i32, %arg1: i32) -> (i32, i32, i32) {
    %c0_i32 = arith.constant 0 : i32
    %c0_i32_0 = arith.constant 0 : i32
    %c0_i32_1 = arith.constant 0 : i32
    return %arg0, %c0_i32, %c0_i32_0 : i32, i32, i32
  }
}

</mosaic_0001>

<bundles_post_ra>
// kernel: tpu_custom_call.1
= control target key start
LH: loop header
LB: loop body
LE: loop exit
PB: predicated region body
PF: predicated region fallthrough
CT: control target
= control target key end

     0   :  { %7 = vsyncpa [#allocation4], 0  ;;  %s818_s0 = inlined_call_operand.hbm [shape: f32[2,8,128], index: 0, kind: input, shape index: {}]   ;;  %s819_s1 = inlined_call_operand.hbm [shape: f32[2,8,128], index: 1, kind: input, shape index: {}]   ;;  %s820_s2 = inlined_call_operand.hbm [shape: f32[2,8,128], index: 2, kind: output, shape index: {}]  }
   0x1   :  { %9 = vsyncpa [#allocation4 + $0x1], 0 }
   0x2   :  { %10 = vsyncpa [#allocation7], 0 }
   0x3   :  { %12 = vsyncpa [#allocation7 + $0x1], 0 }
   0x4   :  { %13 = vsyncpa [#allocation5], 0 }
   0x5   :  { %15 = vsyncpa [#allocation5 + $0x1], 0  ;;  %s598_s9 = smov 0   ;;  %s600_s10 = smov 0  }
   0x6   :  { %s602_s11 = smov 0   ;;  %s604_s12 = smov 0  }
   0x7   :  { %s606_s13 = smov 0   ;;  %s608_s14 = smov 0  }
   0x8 LB: > { %s349_s15 = sadd.s32 4294967295, %s578_s14   ;;  %s350_s16 = sadd.s32 4294967294, %s578_s14   ;;  %s578_s14 = sphi %s608_s14, %s21_s14   ;;  %s574_s13 = sphi %s606_s13, %s840_s13   ;;  %s570_s12 = sphi %s604_s12, %s839_s12   ;;  %s566_s11 = sphi %s602_s11, %s838_s11   ;;  %s562_s10 = sphi %s600_s10, %s837_s10   ;;  %s558_s9 = sphi %s598_s9, %s836_s9  }
   0x9   : > { %s33_s17 = sadd.s32 1, %s574_s13  ;;  %s42_s18 = sadd.s32 1, %s566_s11 }
   0xa   : > { %p35_p0 = scmp.ge.s32.totalorder %s33_s17, 2  ;;  %p49_p1 = scmp.ne.s32.totalorder %s566_s11, %s562_s10 }
   0xb   : > { %p50_p2 = scmp.eq.s32.totalorder %s578_s14, 0  ;;  %p55_p3 = scmp.ne.s32.totalorder %s562_s10, %s558_s9 }
   0xc   : > { %s842_s17 = smov (%p35_p0, %s33_s17), 0  ;;  %p56_p5 = scmp.eq.s32.totalorder %s349_s15, 0 }
   0xd   : > { %p639_p4 = por %p50_p2, %p49_p1  ;;  %s37_s20 = ssub.s32 %s574_s13, %s842_s17 }
   0xe   : > { %p107_p6 = scmp.eq.s32.totalorder %s349_s15, 1  ;;  %p40_p7 = scmp.eq.s32.totalorder %s37_s20, 0 }
   0xf   : > { %p645_p8 = por %p56_p5, %p55_p3  ;;  %p113_p10 = scmp.eq.s32.totalorder %s350_s16, 1 }
  0x10   : > { %p649_p9 = por %p107_p6, %p49_p1  ;;  %p382_p13 = scmp.lt.s32.totalorder %s578_s14, 2 }
  0x11   : > { %s824_s21 = scalar_select %p645_p8, 1, 0 }
  0x12   : > { %s825_s22 = scalar_select %p649_p9, 1, 0 }
  0x13   : > { %s654_s23 = scalar_select %p40_p7, %s566_s11, %s42_s18  }
  0x14   : > { %p656_p11 = por %p113_p10, %p55_p3  ;;  %s663_s25 = sand.u32 1, %s566_s11  }
  0x15   : > { %s353_s26 = sshll.u32 %s663_s25, 3  ;;  %s354_s27 = sshll.u32 %s574_s13, 7 }
  0x16   : > { %s826_s24 = scalar_select %p656_p11, 1, 0 }
  0x17   : > { %s672_s30 = scalar_lea.hbm %s818_s0, %s354_s27  ;;  %s137_s3 = scalar_lea.vmem [#allocation3], %s353_s26 }
  0x18   : > { %s145_s4 = sshll.u32 %s137_s3, 4  ;;  %p680_p0 = pnand %p382_p13, %p639_p4  ;;  %s676_s4 = int_to_ptr.vmem [resolvable:$true] %s145_s4 }
  0x19   : > { %s134_s6 = scalar_lea.sflag [#allocation4], %s663_s25  ;;  %s432_s7 = scalar_lea.hbm %s672_s30, 128 }
  0x1a   : > { %p433_p3 = scmp.ne.s32.totalorder %s672_s30, %s432_s7  ;;  %p434_p5 = pneg %p680_p0 }
  0x1b   : > { %s437_s16 = scalar_lea.hbm %s818_s0, 256  ;;  %p438_p4 = scmp.lt.u32.totalorder %s672_s30, %s818_s0 }
  0x1c   : > { %p435_p6 = pnand %p434_p5, %p433_p3  ;;  %p439_p10 = scmp.lt.u32.totalorder %s437_s16, %s432_s7 }
  0x1d   : > { %p441_p12 = scmp.lt.u32.totalorder %s432_s7, %s672_s30 }
  0x1e   : > { %p436_p7 = pneg %p435_p6  ;;  %p440_p13 = por %p439_p10, %p438_p4 }
  0x20   : > { %p442_p1 = por %p441_p12, %p440_p13 }
  0x22   : > { %p443_p2 = pnand %p442_p1, %p436_p7 }
  0x24   : > { %446 = shalt.err (!%p443_p2)
}
  0x25   : > { %s447_s20 = scalar_lea.vmem %s676_s4, 128  ;;  %s580_s28 = smov [#allocation3]  }
  0x26   : > { %p448_p3 = scmp.ne.s32.totalorder %s676_s4, %s447_s20  ;;  %s452_s29 = sshll.u32 %s580_s28, 4  ;;  %s453_s29 = int_to_ptr.vmem [resolvable:$false] %s452_s29 }
  0x27   : > { %s454_s3 = scalar_lea.vmem %s453_s29, 256  ;;  %p455_p9 = scmp.lt.s32.totalorder %s676_s4, %s453_s29 }
  0x28   : > { %p450_p6 = pnand %p448_p3, %p434_p5  ;;  %p456_p4 = scmp.lt.s32.totalorder %s454_s3, %s447_s20 }
  0x2a   : > { %p451_p11 = pneg %p450_p6  ;;  %p457_p10 = por %p456_p4, %p455_p9 }
  0x2c   : > { %p458_p12 = pnand %p457_p10, %p451_p11 }
  0x2e   : > { %461 = shalt.err (!%p458_p12)
}
  0x2f   : > { %374 = dma.hbm_to_vmem [thread:$0]  (!%p680_p0), %s672_s30, 128, %s676_s4, %s134_s6  }
  0x30   : > { %p828_p1 = scmp.lt.s32.totalorder %s578_s14, 3  ;;  %p829_p2 = scmp.ge.s32.totalorder %s578_s14, 1 }
  0x31   : > { %s725_s16 = scalar_lea.hbm %s819_s1, %s354_s27  ;;  %s156_s18 = scalar_lea.vmem [#allocation6], %s353_s26 }
  0x32   : > { %p716_p7 = pnand %p829_p2, %p828_p1  ;;  %s164_s19 = sshll.u32 %s156_s18, 4  ;;  %s165_s19 = int_to_ptr.vmem [resolvable:$true] %s164_s19 }
  0x33   : > { %s153_s30 = scalar_lea.sflag [#allocation7], %s663_s25  ;;  %s462_s4 = scalar_lea.hbm %s725_s16, 128 }
  0x34   : > { %s830_s7 = scalar_select %p716_p7, 1, 0 }
  0x35   : > { %p463_p9 = scmp.ne.s32.totalorder %s725_s16, %s462_s4  ;;  %s467_s27 = scalar_lea.hbm %s819_s1, 256 }
  0x36   : > { %p468_p3 = scmp.lt.u32.totalorder %s725_s16, %s819_s1  ;;  %p469_p6 = scmp.lt.u32.totalorder %s467_s27, %s462_s4 }
  0x37   : > { %p465_p11 = pnand %p463_p9, %p434_p5  ;;  %p471_p10 = scmp.lt.u32.totalorder %s462_s4, %s725_s16 }
  0x38   : > { %p470_p4 = por %p469_p6, %p468_p3 }
  0x39   : > { %p466_p13 = pneg %p465_p11 }
  0x3a   : > { %p472_p12 = por %p471_p10, %p470_p4 }
  0x3c   : > { %p473_p1 = pnand %p472_p12, %p466_p13 }
  0x3e   : > { %476 = shalt.err (!%p473_p1)
}
  0x3f   : > { %s477_s25 = scalar_lea.vmem %s165_s19, 128  ;;  %s581_s26 = smov [#allocation6]  }
  0x40   : > { %p478_p2 = scmp.ne.s32.totalorder %s165_s19, %s477_s25  ;;  %s482_s3 = sshll.u32 %s581_s26, 4  ;;  %s483_s3 = int_to_ptr.vmem [resolvable:$false] %s482_s3 }
  0x41   : > { %s484_s8 = scalar_lea.vmem %s483_s3, 256  ;;  %p485_p8 = scmp.lt.s32.totalorder %s165_s19, %s483_s3 }
  0x42   : > { %p480_p9 = pnand %p478_p2, %p434_p5  ;;  %p486_p7 = scmp.lt.s32.totalorder %s484_s8, %s477_s25 }
  0x44   : > { %p481_p11 = pneg %p480_p9  ;;  %p487_p3 = por %p486_p7, %p485_p8 }
  0x46   : > { %p488_p6 = pnand %p487_p3, %p481_p11 }
  0x48   : > { %491 = shalt.err (!%p488_p6)
}
  0x49   : > { %377 = dma.hbm_to_vmem [thread:$0]  (!%p680_p0), %s725_s16, 128, %s165_s19, %s153_s30  }
  0x4a   : > { %p831_p13 = scmp.ne.s32.totalorder %s830_s7, 0 }
  0x4b   : > { %s752_s15 = sand.u32 (!%p831_p13), 1, %s562_s10   ;;  %p832_p5 = scmp.ne.s32.totalorder (!%p831_p13), %s824_s21, 0 }
  0x4c   : > { %173 = sbr.rel (%p831_p13) target bundleno = 112 (0x70), region = 28  ;;  %s358_s18 = sshll.u32 (!%p831_p13), %s752_s15, 3 }
  0x4d   : > { %s176_s4 = scalar_lea.sflag (!%p831_p13), [#allocation4], %s752_s15  ;;  %s179_s6 = scalar_lea.vmem (!%p831_p13), [#allocation3], %s358_s18 }
  0x53   : > { %545 = dma.done.wait (%p832_p5), %s176_s4, 128  }
  0x54   : > { %547 = vsyncadd (%p832_p5), %s176_s4, 4294967168  ;;  %s185_s5 = scalar_lea.sflag [#allocation7], %s752_s15  ;;  %s188_s16 = scalar_lea.vmem [#allocation6], %s358_s18 }
  0x55   : > { %549 = dma.done.wait (%p832_p5), %s185_s5, 128  }
  0x56   : > { %551 = vsyncadd (%p832_p5), %s185_s5, 4294967168  ;;  %v219_v0 = vld [vmem:[%s179_s6] sm:$0xff]  ;;  %v220_v1 = vld [vmem:[%s188_s16] sm:$0xff]  ;;  %s213_s7 = scalar_lea.vmem [#allocation8], %s358_s18  ;;  %s362_s30 = sshll.u32 %s570_s12, 7 }
  0x57   : > { %s246_s19 = sshll.u32 %s213_s7, 4  ;;  %v221_v2 = vsub.f32 %v220_v1, %v219_v0  ;;  %s771_s21 = scalar_lea.hbm %s820_s2, %s362_s30  ;;  %s766_s19 = int_to_ptr.vmem [resolvable:$true] %s246_s19 }
  0x58   : > { %s233_s28 = scalar_lea.sflag [#allocation5], %s752_s15  ;;  %s492_s29 = scalar_lea.vmem %s766_s19, 128 }
  0x59   : > { %v222_v3 = vand.u32 2147483647, %v221_v2  ;;  %p493_p8 = scmp.ne.s32.totalorder %s766_s19, %s492_s29  ;;  %p833_p0 = scmp.ne.s32.totalorder %s825_s22, 0 }
  0x5a   : > { %s582_s12 = smov [#allocation8]  }
  0x5b   : > { %231 = vst [vmem:[%s213_s7] sm:$0xff] %v222_v3  ;;  %p494_p7 = pnand %p493_p8, %p833_p0  ;;  %s496_s25 = sshll.u32 %s582_s12, 4  ;;  %s497_s25 = int_to_ptr.vmem [resolvable:$false] %s496_s25 }
  0x5c   : > { %s498_s26 = scalar_lea.vmem %s497_s25, 256  ;;  %p499_p10 = scmp.lt.s32.totalorder %s766_s19, %s497_s25 }
  0x5d   : > { %p495_p4 = pneg %p494_p7  ;;  %p500_p12 = scmp.lt.s32.totalorder %s498_s26, %s492_s29 }
  0x5f   : > { %p501_p1 = por %p500_p12, %p499_p10 }
  0x61   : > { %p502_p2 = pnand %p501_p1, %p495_p4 }
  0x63   : > { %505 = shalt.err (!%p502_p2)
}
  0x64   : > { %s506_s3 = scalar_lea.hbm %s771_s21, 128  ;;  %s510_s18 = scalar_lea.hbm %s820_s2, 256 }
  0x65   : > { %p507_p9 = scmp.ne.s32.totalorder %s771_s21, %s506_s3  ;;  %p511_p6 = scmp.lt.u32.totalorder %s771_s21, %s820_s2 }
  0x66   : > { %p512_p13 = scmp.lt.u32.totalorder %s510_s18, %s506_s3  ;;  %p514_p8 = scmp.lt.u32.totalorder %s506_s3, %s771_s21 }
  0x67   : > { %p508_p11 = pnand %p507_p9, %p833_p0 }
  0x68   : > { %p513_p5 = por %p512_p13, %p511_p6 }
  0x69   : > { %p509_p3 = pneg %p508_p11 }
  0x6a   : > { %p515_p7 = por %p514_p8, %p513_p5 }
  0x6c   : > { %p516_p4 = pnand %p515_p7, %p509_p3 }
  0x6e   : > { %519 = shalt.err (!%p516_p4)
}
  0x6f   : > { %369 = dma.vmem_to_hbm [thread:$0]  (%p833_p0), %s766_s19, 128, %s771_s21, %s233_s28  }
  0x70 PF: > { %s258_s5 = sand.u32 1, %s558_s9   ;;  %p834_p10 = scmp.ne.s32.totalorder %s826_s24, 0 }
  0x71   : > { %p835_p12 = scmp.ge.s32.totalorder %s578_s14, 2  ;;  %s259_s16 = scalar_lea.sflag [#allocation5], %s258_s5 }
  0x73   : > { %p379_p1 = pnand %p835_p12, %p834_p10 }
  0x75   : > { %553 = dma.done.wait (!%p379_p1), %s259_s16, 128  }
  0x76   : > { %555 = vsyncadd (!%p379_p1), %s259_s16, 4294967168  ;;  %s21_s14 = sadd.s32 1, %s578_s14   ;;  %s836_s9 = smov %s562_s10 }
  0x77   : > { %p18_p2 = scmp.ge.s32.totalorder %s21_s14, 4   ;;  %s837_s10 = smov %s566_s11 }
  0x78   : > { %s838_s11 = smov %s654_s23  ;;  %s839_s12 = smov %s574_s13 }
  0x79   : > { %s840_s13 = smov %s842_s17  ;;  %20 = sbr.rel (!%p18_p2) target bundleno = 8 (0x8), region = 94 }
  0x80   :  { %264 = vsyncpa [#allocation4], 1 }
  0x81   :  { %266 = vsyncpa [#allocation4 + $0x1], 1 }
  0x82   :  { %267 = vsyncpa [#allocation7], 1 }
  0x83   :  { %269 = vsyncpa [#allocation7 + $0x1], 1 }
  0x84   :  { %270 = vsyncpa [#allocation5], 1 }
  0x85   :  { %272 = vsyncpa [#allocation5 + $0x1], 1 }

</bundles_post_ra>
